<compile_context>
chip_gen: v5e
topology: v5e:2x2
jax: 0.10.0
libtpu: 0.0.40
codegen_flags: <defaults>
</compile_context>

<pallas_src>
import functools
import math

import jax
import jax.numpy as jnp
from jax.experimental import pallas as pl
from jax.experimental.pallas import tpu as pltpu


def _to_2tuple(v):
    if isinstance(v, (tuple, list)):
        assert len(v) == 2
        return tuple(v)
    return (v, v)


def _pad_kernel(x_ref, o_ref, *, pad_top, pad_bottom, pad_left, pad_right):
    # x_ref: (blk, H, W) VMEM tile, o_ref: (blk, H_out, W_out) VMEM tile.
    # Build the padded tile in-register and issue a single full-tile store.
    o_ref[...] = jnp.pad(
        x_ref[...],
        ((0, 0), (pad_top, pad_bottom), (pad_left, pad_right)),
    )


def _choose_blk(total, h, w, h_out, w_out, dtype_bytes, budget_bytes):
    """Largest divisor of `total` whose double-buffered in+out tiles fit."""
    per_slab = 2 * (h * w + h_out * w_out) * dtype_bytes  # 2x: double-buffering
    max_blk = max(1, budget_bytes // per_slab)
    for d in range(min(total, max_blk), 0, -1):
        if total % d == 0:
            return d
    return 1


def adaptive_padding(x, kernel_size=1, stride=1, dilation=1, padding='corner'):
    """JAX/Pallas equivalent of AdaptivePadding.forward:
    'corner' pads zeros bottom/right, 'same' pads zeros around the input."""
    assert padding in ('same', 'corner')
    kh, kw = _to_2tuple(kernel_size)
    sh, sw = _to_2tuple(stride)
    dh, dw = _to_2tuple(dilation)

    n, c, h, w = x.shape
    out_h = math.ceil(h / sh)
    out_w = math.ceil(w / sw)
    pad_h = max((out_h - 1) * sh + (kh - 1) * dh + 1 - h, 0)
    pad_w = max((out_w - 1) * sw + (kw - 1) * dw + 1 - w, 0)

    if pad_h == 0 and pad_w == 0:
        return x

    if padding == 'corner':
        pad_top, pad_left = 0, 0
    else:  # 'same'
        pad_top, pad_left = pad_h // 2, pad_w // 2
    pad_bottom = pad_h - pad_top
    pad_right = pad_w - pad_left

    h_out, w_out = h + pad_h, w + pad_w
    dtype_bytes = x.dtype.itemsize

    # Collapse batch and channel into one slab axis (free leading-dim reshape),
    # then pick the biggest slab block fitting a conservative VMEM budget
    # (safe for v7x's 64 MiB VMEM as well as v5e/v6e's 128 MiB).
    nc = n * c
    x_flat = x.reshape(nc, h, w)
    vmem_block_budget = 16 * 1024 * 1024
    blk = _choose_blk(nc, h, w, h_out, w_out, dtype_bytes, vmem_block_budget)

    kernel = functools.partial(
        _pad_kernel,
        pad_top=pad_top, pad_bottom=pad_bottom,
        pad_left=pad_left, pad_right=pad_right)

    bytes_accessed = nc * (h * w + h_out * w_out) * dtype_bytes
    cost = pl.CostEstimate(
        flops=0, transcendentals=0, bytes_accessed=int(bytes_accessed))

    # Actual footprint: double-buffered in + out tiles, plus 1 MiB headroom.
    needed = 2 * blk * (h * w + h_out * w_out) * dtype_bytes + (1 << 20)
    vmem_limit = int(min(48 * 1024 * 1024, max(needed, 8 * 1024 * 1024)))

    out_flat = pl.pallas_call(
        kernel,
        out_shape=jax.ShapeDtypeStruct((nc, h_out, w_out), x.dtype),
        grid=(nc // blk,),
        in_specs=[pl.BlockSpec((blk, h, w), lambda i: (i, 0, 0))],
        out_specs=pl.BlockSpec((blk, h_out, w_out), lambda i: (i, 0, 0)),
        compiler_params=pltpu.CompilerParams(
            dimension_semantics=("parallel",),
            vmem_limit_bytes=vmem_limit,
        ),
        cost_estimate=cost,
    )(x_flat)

    return out_flat.reshape(n, c, h_out, w_out)


if __name__ == "__main__":
    key = jax.random.PRNGKey(0)

    # Small shapes consistent with the module's docstring example:
    # kernel_size = stride = 16, input (N=2, C=4, H=15, W=17) -> padded (16, 32)
    x = jax.random.normal(key, (2, 4, 15, 17), dtype=jnp.float32)

    # "corner" mode: pad zeros to bottom/right
    y_corner = adaptive_padding(x, kernel_size=16, stride=16, dilation=1,
                                padding='corner')
    y_corner = jax.block_until_ready(y_corner)
    assert y_corner.shape == (2, 4, 16, 32), y_corner.shape
    ref_corner = jnp.pad(x, ((0, 0), (0, 0), (0, 1), (0, 15)))
    assert jnp.allclose(y_corner, ref_corner), "corner mode mismatch"

    # "same" mode: pad zeros around the input
    y_same = adaptive_padding(x, kernel_size=16, stride=16, dilation=1,
                              padding='same')
    y_same = jax.block_until_ready(y_same)
    assert y_same.shape == (2, 4, 16, 32), y_same.shape
    ref_same = jnp.pad(x, ((0, 0), (0, 0), (0, 1), (7, 8)))
    assert jnp.allclose(y_same, ref_same), "same mode mismatch"

    # Only-width padding case (H already divisible)
    x3 = jax.random.normal(key, (2, 4, 16, 17), dtype=jnp.float32)
    y3 = jax.block_until_ready(
        adaptive_padding(x3, kernel_size=16, stride=16, padding='corner'))
    assert y3.shape == (2, 4, 16, 32)
    assert jnp.allclose(y3, jnp.pad(x3, ((0, 0), (0, 0), (0, 0), (0, 15))))

    # No-padding-needed case returns input unchanged
    x2 = jax.random.normal(key, (2, 4, 16, 16), dtype=jnp.float32)
    y2 = jax.block_until_ready(adaptive_padding(x2, kernel_size=16, stride=16))
    assert y2.shape == x2.shape and jnp.allclose(y2, x2)

    print("KERNEL_OK")
</pallas_src>

<mosaic_0001>
module attributes {stable_mosaic.version = 11 : i64} {
  func.func @_pad_kernel(%arg0: i32, %arg1: memref<8x15x17xf32, #tpu.memory_space<vmem>>, %arg2: memref<8x16x32xf32, #tpu.memory_space<vmem>>) attributes {dimension_semantics = [#tpu.dimension_semantics<parallel>], iteration_bounds = array<i64: 1>, scalar_prefetch = 0 : i64, scratch_operands = 0 : i64, tpu.core_type = #tpu.core_type<tc>, window_params = [{transform_indices = @transform_0, window_bounds = array<i64: 8, 15, 17>}, {transform_indices = @transform_1, window_bounds = array<i64: 8, 16, 32>}]} {
    %c0 = arith.constant 0 : index
    %c0_0 = arith.constant 0 : index
    %c0_1 = arith.constant 0 : index
    %0 = vector.load %arg1[%c0, %c0_0, %c0_1] : memref<8x15x17xf32, #tpu.memory_space<vmem>>, vector<8x15x17xf32>
    %c0_i32 = arith.constant 0 : i32
    %1 = arith.sitofp %c0_i32 : i32 to f32
    %2 = vector.broadcast %1 : f32 to vector<8x1x17xf32>
    %3 = tpu.concatenate %0, %2 in 1 : vector<8x15x17xf32>, vector<8x1x17xf32> -> vector<8x16x17xf32>
    %4 = vector.broadcast %1 : f32 to vector<8x16x15xf32>
    %5 = tpu.concatenate %3, %4 in 2 : vector<8x16x17xf32>, vector<8x16x15xf32> -> vector<8x16x32xf32>
    %c0_2 = arith.constant 0 : index
    %c0_3 = arith.constant 0 : index
    %c0_4 = arith.constant 0 : index
    %6 = vector.load %arg2[%c0_2, %c0_3, %c0_4] : memref<8x16x32xf32, #tpu.memory_space<vmem>>, vector<8x16x32xf32>
    tpu.vector_store %arg2[%c0_2, %c0_3, %c0_4], %5 {strides = array<i32>} : memref<8x16x32xf32, #tpu.memory_space<vmem>>, vector<8x16x32xf32>,
    return
  }
  func.func @transform_0(%arg0: i32) -> (i32, i32, i32) {
    %c0_i32 = arith.constant 0 : i32
    %c0_i32_0 = arith.constant 0 : i32
    %c0_i32_1 = arith.constant 0 : i32
    return %arg0, %c0_i32, %c0_i32_0 : i32, i32, i32
  }
  func.func @transform_1(%arg0: i32) -> (i32, i32, i32) {
    %c0_i32 = arith.constant 0 : i32
    %c0_i32_0 = arith.constant 0 : i32
    %c0_i32_1 = arith.constant 0 : i32
    return %arg0, %c0_i32, %c0_i32_0 : i32, i32, i32
  }
}

</mosaic_0001>

<bundles_post_ra>
// kernel: tpu_custom_call.1
= control target key start
LH: loop header
LB: loop body
LE: loop exit
PB: predicated region body
PF: predicated region fallthrough
CT: control target
= control target key end

     0   :  { %vm34_vm0 = vcmask 138240   ;;  %vm51_vm1 = vcmask 261120   ;;  %vm25_vm2 = vcmask 1046528   ;;  %s219_s0 = inlined_call_operand.vmem [shape: f32[8,15,17], index: 0, kind: input, shape index: {}]   ;;  %s220_s1 = inlined_call_operand.hbm [shape: f32[8,16,32], index: 1, kind: output, shape index: {}]  }
   0x1   :  { %v9_v0 = vld [vmem:[%s219_s0] sm:$0xff]  ;;  %v10_v1 = vld [vmem:[%s219_s0 + $0x8] sm:$0x7f]  ;;  %v11_v4 = vld [vmem:[%s219_s0 + $0x10] sm:$0xff] }
   0x2   :  { %v35_v2 = vsel %vm34_vm0, %v9_v0, 0.0  ;;  %v26_v3 = vsel %vm25_vm2, %v10_v1, 0.0  ;;  %v12_v5 = vld [vmem:[%s219_s0 + $0x18] sm:$0x7f]  ;;  %v13_v6 = vld [vmem:[%s219_s0 + $0x20] sm:$0xff]  ;;  %v37_v8 = vsel %vm34_vm0, %v11_v4, 0.0 }
   0x3   :  { %52 = vst.msk [vmem:[#allocation2] sm:$0xff] %vm51_vm1, %v35_v2  ;;  %v36_v7 = vsel %vm34_vm0, %v26_v3, 0.0  ;;  %v27_v9 = vsel %vm25_vm2, %v12_v5, 0.0  ;;  %v15_v10 = vld [vmem:[%s219_s0 + $0x30] sm:$0xff]  ;;  %v39_v12 = vsel %vm34_vm0, %v13_v6, 0.0  ;;  %v17_v16 = vld [vmem:[%s219_s0 + $0x40] sm:$0xff] }
   0x4   :  { %53 = vst.msk [vmem:[#allocation2 + $0x8] sm:$0xff] %vm51_vm1, %v36_v7  ;;  %v38_v11 = vsel %vm34_vm0, %v27_v9, 0.0  ;;  %v14_v13 = vld [vmem:[%s219_s0 + $0x28] sm:$0x7f]  ;;  %v16_v15 = vld [vmem:[%s219_s0 + $0x38] sm:$0x7f] }
   0x5   :  { %54 = vst.msk [vmem:[#allocation2 + $0x10] sm:$0xff] %vm51_vm1, %v37_v8  ;;  %v28_v14 = vsel %vm25_vm2, %v14_v13, 0.0  ;;  %v41_v18 = vsel %vm34_vm0, %v15_v10, 0.0  ;;  %v29_v19 = vsel %vm25_vm2, %v16_v15, 0.0  ;;  %v18_v20 = vld [vmem:[%s219_s0 + $0x48] sm:$0x7f] }
   0x6   :  { %55 = vst.msk [vmem:[#allocation2 + $0x18] sm:$0xff] %vm51_vm1, %v38_v11  ;;  %v40_v17 = vsel %vm34_vm0, %v28_v14, 0.0  ;;  %v42_v21 = vsel %vm34_vm0, %v29_v19, 0.0  ;;  %v30_v22 = vsel %vm25_vm2, %v18_v20, 0.0  ;;  %v19_v23 = vld [vmem:[%s219_s0 + $0x50] sm:$0xff]  ;;  %v43_v25 = vsel %vm34_vm0, %v17_v16, 0.0 }
   0x7   :  { %56 = vst.msk [vmem:[#allocation2 + $0x20] sm:$0xff] %vm51_vm1, %v39_v12  ;;  %v20_v24 = vld [vmem:[%s219_s0 + $0x58] sm:$0x7f]  ;;  %v22_v27 = vld [vmem:[%s219_s0 + $0x68] sm:$0x7f]  ;;  %v44_v28 = vsel %vm34_vm0, %v30_v22, 0.0 }
   0x8   :  { %57 = vst.msk [vmem:[#allocation2 + $0x28] sm:$0xff] %vm51_vm1, %v40_v17  ;;  %v31_v26 = vsel %vm25_vm2, %v20_v24, 0.0  ;;  %v21_v29 = vld [vmem:[%s219_s0 + $0x60] sm:$0xff]  ;;  %v24_v30 = vld [vmem:[%s219_s0 + $0x78] sm:$0x7f]  ;;  %v45_v31 = vsel %vm34_vm0, %v19_v23, 0.0 }
   0x9   :  { %58 = vst.msk [vmem:[#allocation2 + $0x30] sm:$0xff] %vm51_vm1, %v41_v18  ;;  %v32_v32 = vsel %vm25_vm2, %v22_v27, 0.0 }
   0xa   :  { %59 = vst.msk [vmem:[#allocation2 + $0x38] sm:$0xff] %vm51_vm1, %v42_v21 }
   0xb   :  { %6 = vsyncpa [#allocation3], 0  ;;  %60 = vst.msk [vmem:[#allocation2 + $0x40] sm:$0xff] %vm51_vm1, %v43_v25  ;;  %v46_v33 = vsel %vm34_vm0, %v31_v26, 0.0  ;;  %v23_v34 = vld [vmem:[%s219_s0 + $0x70] sm:$0xff]  ;;  %v47_v35 = vsel %vm34_vm0, %v21_v29, 0.0 }
   0xc   :  { %61 = vst.msk [vmem:[#allocation2 + $0x48] sm:$0xff] %vm51_vm1, %v44_v28  ;;  %v33_v36 = vsel %vm25_vm2, %v24_v30, 0.0  ;;  %s115_s9 = smov [#allocation2]   ;;  %s74_s13 = sshll.u32 %s220_s1, 4  ;;  %v48_v37 = vsel %vm34_vm0, %v32_v32, 0.0  ;;  %v49_v38 = vsel %vm34_vm0, %v23_v34, 0.0  ;;  %s75_s13 = int_to_ptr.hbm [resolvable:$true] %s74_s13 }
   0xd   :  { %s72_s10 = sshll.u32 %s115_s9, 4  ;;  %62 = vst.msk [vmem:[#allocation2 + $0x50] sm:$0xff] %vm51_vm1, %v45_v31  ;;  %v50_v39 = vsel %vm34_vm0, %v33_v36, 0.0  ;;  %s116_s0 = smov 128   ;;  %s73_s10 = int_to_ptr.vmem [resolvable:$true] %s72_s10 }
   0xe   :  { %63 = vst.msk [vmem:[#allocation2 + $0x58] sm:$0xff] %vm51_vm1, %v46_v33  ;;  %s117_s1 = smov 8  }
   0xf   :  { %64 = vst.msk [vmem:[#allocation2 + $0x60] sm:$0xff] %vm51_vm1, %v47_v35 }
  0x10   :  { %65 = vst.msk [vmem:[#allocation2 + $0x68] sm:$0xff] %vm51_vm1, %v48_v37 }
  0x11   :  { %66 = vst.msk [vmem:[#allocation2 + $0x70] sm:$0xff] %vm51_vm1, %v49_v38 }
  0x12   :  { %67 = vst.msk [vmem:[#allocation2 + $0x78] sm:$0xff] %vm51_vm1, %v50_v39 }
  0x13   :  { %80 = dma.vmem_to_hbm [thread:$0]  %s73_s10, 2048, %s75_s13, [#allocation3], %s116_s0, %s116_s0, %s117_s1  }
  0x14   :  { %113 = dma.done.wait [#allocation3], 2048  }
  0x15   :  { %114 = vsyncadd [#allocation3], 4294965248 }
  0x16   :  { %85 = vsyncpa [#allocation3], 1 }

</bundles_post_ra>
